<compile_context>
chip_gen: v7x
topology: tpu7x:2x2x1
jax: 0.10.0
libtpu: 0.0.40
codegen_flags: <defaults>
</compile_context>

<pallas_src>
import functools

import numpy as np
import jax
import jax.numpy as jnp
from jax import lax
from jax.experimental import pallas as pl
from jax.experimental.pallas import tpu as pltpu


_DEFAULT_KERNEL = np.array([[-1., -1., -1.],
                            [-1.,  8., -1.],
                            [-1., -1., -1.]], dtype=np.float32) / 8.0


def _shift_zero(x, s, axis):
    """y[..., i, ...] = x[..., i + s, ...] for in-range i + s, else 0 (static s).

    Built from a static slice + concat with a zero border so the data stays in
    vregs (lane/sublane shift) -- no VMEM scratch, no full-array stores.
    """
    if s == 0:
        return x
    n = x.shape[axis]
    if abs(s) >= n:
        return jnp.zeros_like(x)
    zshape = list(x.shape)
    zshape[axis] = abs(s)
    zeros = jnp.zeros(zshape, x.dtype)
    if s > 0:
        body = lax.slice_in_dim(x, s, n, axis=axis)
        return jnp.concatenate([body, zeros], axis=axis)
    body = lax.slice_in_dim(x, 0, n + s, axis=axis)
    return jnp.concatenate([zeros, body], axis=axis)


def _write_partial(sq, out_ref):
    """Deferred reduction: batch + row axes first (plain VALU adds / sublane folds),
    one cross-lane (XLU) reduce last; store the scalar partial lane-broadcast."""
    t = jnp.sum(sq, axis=0, keepdims=True)     # (1, H, W)  adds across images
    t = jnp.sum(t, axis=1, keepdims=True)      # (1, 1, W)  adds across rows
    t = jnp.sum(t, axis=2, keepdims=True)      # (1, 1, 1)  single lane reduce
    out_ref[...] = jnp.broadcast_to(t, out_ref.shape)


def _laplacian_kernel(x_ref, out_ref):
    """Default-kernel fast path (scratch-free).

    t = 9*x - box3x3(x) = 8 * edge (zero-padded cross-correlation);
    partial = sum(t**2).  The /8 (/64 on squares) is folded into the final divide.
    """
    x = x_ref[...].astype(jnp.float32)
    # Horizontal 3-sum: h[r, c] = x[r, c-1] + x[r, c] + x[r, c+1]  (zero boundary).
    h = _shift_zero(x, -1, axis=2) + x + _shift_zero(x, 1, axis=2)
    # Vertical 3-sum of h -> full 3x3 box sum (zero boundary).
    box = _shift_zero(h, -1, axis=1) + h + _shift_zero(h, 1, axis=1)
    t = 9.0 * x - box
    _write_partial(t * t, out_ref)


def _generic_kernel(x_ref, out_ref, *, pad, weights):
    """Fallback for user-supplied odd square kernels: unrolled tap sum with weights
    baked as Python constants.  Column shifts are hoisted and shared across rows;
    everything stays in registers (no padded VMEM scratch, no full-array zeroing)."""
    x = x_ref[...].astype(jnp.float32)
    kh = len(weights)
    kw = len(weights[0])
    cols = [_shift_zero(x, dx - pad, axis=2) for dx in range(kw)]
    edge = None
    for dy in range(kh):
        row = None
        for dx in range(kw):
            w = weights[dy][dx]
            if w == 0.0:
                continue
            term = cols[dx] if w == 1.0 else (-cols[dx] if w == -1.0 else w * cols[dx])
            row = term if row is None else row + term
        if row is None:
            continue
        shifted = _shift_zero(row, dy - pad, axis=1)
        edge = shifted if edge is None else edge + shifted
    if edge is None:
        edge = jnp.zeros_like(x)
    _write_partial(edge * edge, out_ref)


def _pick_b_tile(nc, per_img_bytes, batch_tile_bytes):
    """Largest divisor of nc whose block fits the byte budget.  A divisor means no
    host-side zero-padding/concatenate (no extra HBM pass).  Capped at nc//2 so the
    'parallel' grid axis has >= 2 steps whenever possible (feeds both v7x cores)."""
    budget = max(1, int(batch_tile_bytes) // max(int(per_img_bytes), 1))
    cap = nc if nc < 2 else max(1, nc // 2)
    target = max(1, min(nc, budget, cap))
    for b in range(target, 0, -1):
        if nc % b == 0:
            return b
    return 1


def phase_gradient_loss(phase, kernel=None, *, batch_tile_bytes=4 << 20):
    """JAX/Pallas equivalent of odak phase_gradient().forward(phase)."""
    if kernel is None:
        kernel = _DEFAULT_KERNEL
    kernel = np.asarray(kernel, dtype=np.float32)
    kernel = kernel.reshape(kernel.shape[-2], kernel.shape[-1])
    kh, kw = kernel.shape
    # The original module uses padding = kernel.shape[-1] // 2 for both dims; only an
    # odd square kernel keeps output spatial dims == input dims (true for the default).
    assert kh == kw and kh % 2 == 1, "Pallas path supports odd square kernels"
    pad = kw // 2

    phase = jnp.asarray(phase)
    if phase.ndim == 2:
        phase = phase[None, None]
    n, c, h, w = phase.shape
    # NOTE: PyTorch's F.conv2d with a (1,1,kh,kw) kernel is only defined for c == 1;
    # for c > 1 this path generalizes by treating each channel as an independent image.
    nc = n * c
    if phase.dtype not in (jnp.float32, jnp.bfloat16):
        phase = phase.astype(jnp.float32)      # keep f32/bf16 native: fewer HBM bytes
    x = phase.reshape(nc, h, w)

    per_img_bytes = h * w * x.dtype.itemsize
    b_tile = _pick_b_tile(nc, per_img_bytes, batch_tile_bytes)
    steps = nc // b_tile

    is_default = (kh == 3 and np.allclose(kernel, _DEFAULT_KERNEL))
    if is_default:
        body = _laplacian_kernel
        post_scale = 64.0                      # we accumulated (8 * edge)**2
    else:
        weights = tuple(tuple(float(v) for v in row) for row in kernel)
        body = functools.partial(_generic_kernel, pad=pad, weights=weights)
        post_scale = 1.0

    partials = pl.pallas_call(
        body,
        out_shape=jax.ShapeDtypeStruct((steps, 1, 128), jnp.float32),
        grid=(steps,),
        in_specs=[pl.BlockSpec((b_tile, h, w), lambda i: (i, 0, 0))],
        out_specs=pl.BlockSpec((1, 1, 128), lambda i: (i, 0, 0)),
        compiler_params=pltpu.CompilerParams(
            dimension_semantics=("parallel",),     # independent per-step partials
            vmem_limit_bytes=48 << 20),            # past the default scoped limit
    )(x)

    denom = float(nc * h * w) * post_scale         # numel(edge) [* 64 for fast path]
    return jnp.sum(partials[:, 0, 0]) / denom


def _reference_loss(phase, kernel):
    """Pure-JAX reference (matches PyTorch F.conv2d + MSELoss vs zeros)."""
    kernel = jnp.asarray(kernel, jnp.float32)
    k = kernel.reshape(1, 1, kernel.shape[-2], kernel.shape[-1])
    pad = kernel.shape[-1] // 2
    x = jnp.asarray(phase, jnp.float32)
    if x.ndim == 2:
        x = x[None, None]
    n, c, hh, ww = x.shape
    x = x.reshape(n * c, 1, hh, ww)
    edge = lax.conv_general_dilated(
        x, k, window_strides=(1, 1),
        padding=[(pad, pad), (pad, pad)],
        dimension_numbers=("NCHW", "OIHW", "NCHW"))
    return jnp.mean(edge * edge)


if __name__ == "__main__":
    key = jax.random.PRNGKey(0)
    # batch=2, channels=1 (phase of a complex field is single-channel), spatial=16x16
    phase = jax.random.uniform(key, (2, 1, 16, 16), jnp.float32,
                               minval=0.0, maxval=2.0 * np.pi)

    # Default Laplacian/8 kernel -> separable scratch-free fast path.
    loss = jax.block_until_ready(phase_gradient_loss(phase))
    ref = _reference_loss(phase, _DEFAULT_KERNEL)
    assert jnp.allclose(loss, ref, rtol=1e-4, atol=1e-5), (float(loss), float(ref))

    # User-supplied kernel -> generic baked-constant tap-sum path.
    sobel = np.array([[1., 0., -1.],
                      [2., 0., -2.],
                      [1., 0., -1.]], dtype=np.float32)
    loss2 = jax.block_until_ready(phase_gradient_loss(phase, sobel))
    ref2 = _reference_loss(phase, sobel)
    assert jnp.allclose(loss2, ref2, rtol=1e-4, atol=1e-5), (float(loss2), float(ref2))

    print("KERNEL_OK")
</pallas_src>

<mosaic_0001>
module attributes {stable_mosaic.version = 11 : i64} {
  func.func @_laplacian_kernel(%arg0: i32, %arg1: memref<1x16x16xf32, #tpu.memory_space<vmem>>, %arg2: memref<1x1x128xf32, #tpu.memory_space<vmem>>) attributes {dimension_semantics = [#tpu.dimension_semantics<parallel>], iteration_bounds = array<i64: 2>, scalar_prefetch = 0 : i64, scratch_operands = 0 : i64, tpu.core_type = #tpu.core_type<tc>, window_params = [{transform_indices = @transform_0, window_bounds = array<i64: 1, 16, 16>}, {transform_indices = @transform_1, window_bounds = array<i64: 1, 1, 128>}]} {
    %c0 = arith.constant 0 : index
    %c0_0 = arith.constant 0 : index
    %c0_1 = arith.constant 0 : index
    %0 = vector.load %arg1[%c0, %c0_0, %c0_1] : memref<1x16x16xf32, #tpu.memory_space<vmem>>, vector<1x16x16xf32>
    %cst = arith.constant 0.000000e+00 : f32
    %1 = vector.broadcast %cst : f32 to vector<1x16x1xf32>
    %2 = vector.extract_strided_slice %0 {offsets = [0, 0, 0], sizes = [1, 16, 15], strides = [1, 1, 1]} : vector<1x16x16xf32> to vector<1x16x15xf32>
    %3 = tpu.concatenate %1, %2 in 2 : vector<1x16x1xf32>, vector<1x16x15xf32> -> vector<1x16x16xf32>
    %4 = arith.addf %3, %0 : vector<1x16x16xf32>
    %cst_2 = arith.constant 0.000000e+00 : f32
    %5 = vector.broadcast %cst_2 : f32 to vector<1x16x1xf32>
    %6 = vector.extract_strided_slice %0 {offsets = [0, 0, 1], sizes = [1, 16, 15], strides = [1, 1, 1]} : vector<1x16x16xf32> to vector<1x16x15xf32>
    %7 = tpu.concatenate %6, %5 in 2 : vector<1x16x15xf32>, vector<1x16x1xf32> -> vector<1x16x16xf32>
    %8 = arith.addf %4, %7 : vector<1x16x16xf32>
    %cst_3 = arith.constant 0.000000e+00 : f32
    %9 = vector.broadcast %cst_3 : f32 to vector<1x1x16xf32>
    %10 = vector.extract_strided_slice %8 {offsets = [0, 0, 0], sizes = [1, 15, 16], strides = [1, 1, 1]} : vector<1x16x16xf32> to vector<1x15x16xf32>
    %11 = tpu.concatenate %9, %10 in 1 : vector<1x1x16xf32>, vector<1x15x16xf32> -> vector<1x16x16xf32>
    %12 = arith.addf %11, %8 : vector<1x16x16xf32>
    %cst_4 = arith.constant 0.000000e+00 : f32
    %13 = vector.broadcast %cst_4 : f32 to vector<1x1x16xf32>
    %14 = vector.extract_strided_slice %8 {offsets = [0, 1, 0], sizes = [1, 15, 16], strides = [1, 1, 1]} : vector<1x16x16xf32> to vector<1x15x16xf32>
    %15 = tpu.concatenate %14, %13 in 1 : vector<1x15x16xf32>, vector<1x1x16xf32> -> vector<1x16x16xf32>
    %16 = arith.addf %12, %15 : vector<1x16x16xf32>
    %cst_5 = arith.constant 9.000000e+00 : f32
    %17 = vector.broadcast %cst_5 : f32 to vector<1x16x16xf32>
    %18 = arith.mulf %17, %0 : vector<1x16x16xf32>
    %19 = arith.subf %18, %16 : vector<1x16x16xf32>
    %20 = arith.mulf %19, %19 : vector<1x16x16xf32>
    %cst_6 = arith.constant dense<0.000000e+00> : vector<16x16xf32>
    %21 = vector.multi_reduction <add>, %20, %cst_6 [0] : vector<1x16x16xf32> to vector<16x16xf32>
    %22 = vector.shape_cast %21 : vector<16x16xf32> to vector<1x16x16xf32>
    %cst_7 = arith.constant dense<0.000000e+00> : vector<1x16xf32>
    %23 = vector.multi_reduction <add>, %22, %cst_7 [1] : vector<1x16x16xf32> to vector<1x16xf32>
    %24 = vector.shape_cast %23 : vector<1x16xf32> to vector<1x1x16xf32>
    %cst_8 = arith.constant dense<0.000000e+00> : vector<1x1xf32>
    %25 = vector.multi_reduction <add>, %24, %cst_8 [2] : vector<1x1x16xf32> to vector<1x1xf32>
    %26 = vector.shape_cast %25 : vector<1x1xf32> to vector<1x1x1xf32>
    %27 = vector.shape_cast %26 : vector<1x1x1xf32> to vector<1x1x1xf32>
    %28 = vector.broadcast %27 : vector<1x1x1xf32> to vector<1x1x128xf32>
    %c0_9 = arith.constant 0 : index
    %c0_10 = arith.constant 0 : index
    %c0_11 = arith.constant 0 : index
    %29 = vector.load %arg2[%c0_9, %c0_10, %c0_11] : memref<1x1x128xf32, #tpu.memory_space<vmem>>, vector<1x1x128xf32>
    tpu.vector_store %arg2[%c0_9, %c0_10, %c0_11], %28 {strides = array<i32>} : memref<1x1x128xf32, #tpu.memory_space<vmem>>, vector<1x1x128xf32>,
    return
  }
  func.func @transform_0(%arg0: i32) -> (i32, i32, i32) {
    %c0_i32 = arith.constant 0 : i32
    %c0_i32_0 = arith.constant 0 : i32
    %c0_i32_1 = arith.constant 0 : i32
    return %arg0, %c0_i32, %c0_i32_0 : i32, i32, i32
  }
  func.func @transform_1(%arg0: i32) -> (i32, i32, i32) {
    %c0_i32 = arith.constant 0 : i32
    %c0_i32_0 = arith.constant 0 : i32
    %c0_i32_1 = arith.constant 0 : i32
    return %arg0, %c0_i32, %c0_i32_0 : i32, i32, i32
  }
}

</mosaic_0001>

<bundles_post_ra>
// kernel: tpu_custom_call.1
= control target key start
LH: loop header
LB: loop body
LE: loop exit
PB: predicated region body
PF: predicated region fallthrough
CT: control target
= control target key end

     0   :  { %6 = vsyncpa [#allocation3], 0  ;;  %s618_s0 = inlined_call_operand.hbm [shape: f32[2,16,16], index: 0, kind: input, shape index: {}]   ;;  %s619_s1 = inlined_call_operand.hbm [shape: f32[2,1,128], index: 1, kind: output, shape index: {}]  }
   0x1   :  { %8 = vsyncpa [#allocation3 + $0x1], 0 }
   0x2   :  { %9 = vsyncpa [#allocation4], 0 }
   0x3   :  { %11 = vsyncpa [#allocation4 + $0x1], 0  ;;  %s457_s6 = smov 0   ;;  %s459_s7 = smov 0  }
   0x4   :  { %s461_s8 = smov 0   ;;  %s463_s9 = smov 0  }
   0x5 LB: > { %s478_s10 = sadd.s32 4294967295, %s439_s9   ;;  %s281_s11 = sadd.s32 4294967294, %s439_s9   ;;  %s439_s9 = sphi %s463_s9, %s632_s9   ;;  %s435_s8 = sphi %s461_s8, %s631_s8   ;;  %s431_s7 = sphi %s459_s7, %s630_s7   ;;  %s427_s6 = sphi %s457_s6, %s629_s6  }
   0x6   : > { %s482_s12 = sadd.s32 1, %s439_s9   ;;  %s24_s13 = sadd.s32 1, %s435_s8 }
   0x7   : > { %s21_s14 = ssub.s32 %s439_s9, %s482_s12  ;;  %p31_p0 = scmp.ne.s32.totalorder %s435_s8, %s431_s7 }
   0x8   : > { %p22_p1 = scmp.eq.s32.totalorder %s21_s14, 0  ;;  %p32_p2 = scmp.eq.s32.totalorder %s439_s9, 0 }
   0x9   : > { %p37_p3 = scmp.ne.s32.totalorder %s431_s7, %s427_s6  ;;  %p38_p4 = scmp.eq.s32.totalorder %s478_s10, 0 }
   0xa   : > { %s494_s15 = scalar_select %p22_p1, %s435_s8, %s24_s13  }
   0xb   : > { %p496_p5 = por %p32_p2, %p31_p0  ;;  %p500_p6 = por %p38_p4, %p37_p3 }
   0xc   : > { %p61_p7 = scmp.eq.s32.totalorder %s478_s10, 1  ;;  %p67_p8 = scmp.eq.s32.totalorder %s281_s11, 1 }
   0xd   : > { %p305_p10 = scmp.lt.s32.totalorder %s439_s9, 2  ;;  %s87_s20 = sand.u32 1, %s435_s8  }
   0xe   : > { %p507_p11 = por %p61_p7, %p31_p0  ;;  %p511_p12 = por %p67_p8, %p37_p3 }
   0xf   : > { %s292_s21 = sshll.u32 %s439_s9, 8  ;;  %s284_s22 = sshll.u32 %s87_s20, 4 }
  0x10   : > { %s623_s18 = scalar_select %p507_p11, 1, 0 }
  0x11   : > { %s624_s19 = scalar_select %p511_p12, 1, 0 }
  0x12   : > { %s520_s25 = scalar_lea.hbm %s618_s0, %s292_s21  ;;  %s91_s26 = scalar_lea.vmem [#allocation2], %s284_s22 }
  0x13   : > { %s98_s27 = sshll.u32 %s91_s26, 4  ;;  %p524_p13 = pnand %p305_p10, %p496_p5  ;;  %s528_s27 = int_to_ptr.vmem [resolvable:$true] %s98_s27 }
  0x14   : > { %s530_s29 = scalar_lea.sflag [#allocation3], %s87_s20  ;;  %s343_s30 = scalar_lea.hbm %s520_s25, 256 }
  0x15   : > { %p344_p0 = scmp.ne.s32.totalorder %s520_s25, %s343_s30  ;;  %p345_p1 = pneg %p524_p13 }
  0x16   : > { %s348_s4 = scalar_lea.hbm %s618_s0, 512  ;;  %p349_p4 = scmp.lt.u32.totalorder %s520_s25, %s618_s0 }
  0x17   : > { %p346_p2 = pnand %p345_p1, %p344_p0  ;;  %p350_p5 = scmp.lt.u32.totalorder %s348_s4, %s343_s30 }
  0x18   : > { %p352_p8 = scmp.lt.u32.totalorder %s343_s30, %s520_s25 }
  0x19   : > { %p347_p3 = pneg %p346_p2  ;;  %p351_p7 = por %p350_p5, %p349_p4 }
  0x1b   : > { %p353_p10 = por %p352_p8, %p351_p7 }
  0x1d   : > { %p354_p9 = pnand %p353_p10, %p347_p3 }
  0x1f   : > { %357 = shalt.err (!%p354_p9)
}
  0x20   : > { %s358_s13 = scalar_lea.vmem %s528_s27, 256  ;;  %s441_s14 = smov [#allocation2]  }
  0x21   : > { %p359_p0 = scmp.ne.s32.totalorder %s528_s27, %s358_s13  ;;  %s363_s16 = sshll.u32 %s441_s14, 4  ;;  %s364_s16 = int_to_ptr.vmem [resolvable:$false] %s363_s16 }
  0x22   : > { %s365_s20 = scalar_lea.vmem %s364_s16, 512  ;;  %p366_p11 = scmp.lt.s32.totalorder %s528_s27, %s364_s16 }
  0x23   : > { %p361_p2 = pnand %p359_p0, %p345_p1  ;;  %p367_p4 = scmp.lt.s32.totalorder %s365_s20, %s358_s13 }
  0x25   : > { %p362_p12 = pneg %p361_p2  ;;  %p368_p5 = por %p367_p4, %p366_p11 }
  0x27   : > { %p369_p7 = pnand %p368_p5, %p362_p12 }
  0x29   : > { %372 = shalt.err (!%p369_p7)
}
  0x2a   : > { %s442_s21 = smov 128   ;;  %s443_s22 = smov 8  }
  0x2b   : > { %300 = dma.hbm_to_vmem [thread:$0]  (!%p524_p13), %s520_s25, 256, %s528_s27, %s530_s29, %s442_s21, %s442_s21, %s443_s22  }
  0x2c   : > { %p287_p9 = scmp.ge.s32.totalorder %s439_s9, 1  ;;  %p106_p1 = scmp.lt.s32.totalorder %s439_s9, 3 }
  0x2e   : > { %p107_p3 = pnand %p287_p9, %p106_p1 }
  0x2f   : > { %s561_s23 = sand.u32 (!%p107_p3), 1, %s431_s7  }
  0x30   : > { %110 = sbr.rel (%p107_p3) target bundleno = 364 (0x16c), region = 24  ;;  %s288_s24 = sshll.u32 (!%p107_p3), %s561_s23, 4 }
  0x31   : > { %s113_s26 = scalar_lea.sflag (!%p107_p3), [#allocation3], %s561_s23  ;;  %s116_s30 = scalar_lea.vmem (!%p107_p3), [#allocation2], %s288_s24 }
  0x37   : > { %418 = dma.done.wait (%p500_p6), %s113_s26, 256  }
  0x38   : > { %420 = vsyncadd (%p500_p6), %s113_s26, 4294967040  ;;  %v134_v0 = vld [vmem:[%s116_s30] sm:$0xff]  ;;  %s444_s25 = smov 1   ;;  %s445_s27 = smov 127   ;;  %v135_v1 = vld [vmem:[%s116_s30 + $0x8] sm:$0xff]  ;;  %vm144_vm0 = vcmask 7168  }
  0x39   : > { %138 = vrot.lane.b32.xlu0 %v134_v0, %s444_s25  ;;  %149 = vrot.lane.b32.xlu1 %v134_v0, %s445_s27  ;;  %vm155_vm1 = vcmask 121856   ;;  %vm162_vm2 = vcmask 1040384   ;;  %vm171_vm3 = vcmask 1046528   ;;  %v180_v19 = vmul.f32 9.0, %v134_v0  ;;  %s133_s17 = scalar_lea.vmem [#allocation5], %s561_s23  ;;  %s289_s29 = sshll.u32 %s478_s10, 4 }
  0x3a   : > { %v181_v23 = vmul.f32 9.0, %v135_v1  ;;  %vm188_vm4 = vcmask 130048   ;;  %s215_s28 = sshll.u32 %s133_s17, 4  ;;  %s576_s4 = scalar_lea.hbm %s619_s1, %s289_s29  ;;  %s571_s28 = int_to_ptr.vmem [resolvable:$true] %s215_s28 }
  0x3b   : > { %s203_s5 = scalar_lea.sflag [#allocation4], %s561_s23  ;;  %s373_s11 = scalar_lea.vmem %s571_s28, 16 }
  0x3c   : > { %p374_p6 = scmp.ne.s32.totalorder %s571_s28, %s373_s11  ;;  %p626_p11 = scmp.ne.s32.totalorder %s623_s18, 0 }
  0x3d   : > { %140 = vrot.lane.b32.xlu0 %v135_v1, %s444_s25  ;;  %151 = vrot.lane.b32.xlu1 %v135_v1, %s445_s27  ;;  %s446_s13 = smov [#allocation5]  }
  0x3e   : > { %p375_p12 = pnand %p374_p6, %p626_p11  ;;  %s377_s10 = sshll.u32 %s446_s13, 4  ;;  %s378_s10 = int_to_ptr.vmem [resolvable:$false] %s377_s10 }
  0x3f   : > { %s379_s14 = scalar_lea.vmem %s378_s10, 32  ;;  %p380_p8 = scmp.lt.s32.totalorder %s571_s28, %s378_s10 }
  0x40   : > { %p376_p13 = pneg %p375_p12  ;;  %p381_p10 = scmp.lt.s32.totalorder %s379_s14, %s373_s11 }
  0x42   : > { %p382_p0 = por %p381_p10, %p380_p8 }
  0x44   : > { %p383_p2 = pnand %p382_p0, %p376_p13 }
  0xab   : > { %v139_v2 = vpop.permute.xlu0 %138  ;;  %v150_v3 = vpop.permute.xlu1 %149 }
  0xac   : > { %v145_v4 = vsel %vm144_vm0, 0.0, %v139_v2  ;;  %v156_v5 = vsel %vm155_vm1, %v150_v3, 0.0 }
  0xad   : > { %v147_v6 = vadd.f32 %v145_v4, %v134_v0 }
  0xaf   : > { %v158_v7 = vadd.f32 %v156_v5, %v147_v6  ;;  %v141_v8 = vpop.permute.xlu0 %140  ;;  %v152_v9 = vpop.permute.xlu1 %151 }
  0xb0   : > { %v146_v10 = vsel %vm144_vm0, 0.0, %v141_v8  ;;  %v157_v11 = vsel %vm155_vm1, %v152_v9, 0.0 }
  0xb1   : > { %v163_v12 = vrot.slane %v158_v7, 7  ;;  %v148_v13 = vadd.f32 %v146_v10, %v135_v1  ;;  %v172_v16 = vrot.slane %v158_v7, 1 }
  0xb3   : > { %v168_v14 = vsel %vm162_vm2, 0.0, %v163_v12  ;;  %v159_v15 = vadd.f32 %v157_v11, %v148_v13 }
  0xb4   : > { %v169_v20 = vadd.f32 %v168_v14, %v158_v7 }
  0xb5   : > { %v164_v17 = vrot.slane %v159_v15, 7  ;;  %v173_v18 = vrot.slane %v159_v15, 1 }
  0xb7   : > { %v165_v21 = vsel %vm162_vm2, %v163_v12, %v164_v17  ;;  %v174_v22 = vsel %vm171_vm3, %v172_v16, %v173_v18  ;;  %v177_v26 = vsel %vm171_vm3, %v173_v18, 0.0 }
  0xb8   : > { %v170_v24 = vadd.f32 %v165_v21, %v159_v15  ;;  %v178_v25 = vadd.f32 %v174_v22, %v169_v20 }
  0xba   : > { %v179_v27 = vadd.f32 %v177_v26, %v170_v24  ;;  %v182_v28 = vsub.f32 %v180_v19, %v178_v25 }
  0xbc   : > { %v183_v29 = vsub.f32 %v181_v23, %v179_v27  ;;  %v184_v30 = vmul.f32 %v182_v28, %v182_v28 }
  0xbe   : > { %v185_v31 = vmul.f32 %v183_v29, %v183_v29  ;;  %v189_v32 = vsel %vm188_vm4, %v184_v30, 0.0 }
  0xc0   : > { %v190_v33 = vsel %vm188_vm4, %v185_v31, 0.0 }
  0xc1   : > { %v191_v34 = vadd.f32 %v190_v33, %v189_v32 }
  0xc3   : > { %v192_v35 = vrot.slane %v191_v34, 4 }
  0xc5   : > { %v193_v36 = vadd.f32 %v192_v35, %v191_v34 }
  0xc7   : > { %v194_v37 = vrot.slane %v193_v36, 2 }
  0xc9   : > { %v195_v38 = vadd.f32 %v194_v37, %v193_v36 }
  0xcb   : > { %v196_v39 = vrot.slane %v195_v38, 1 }
  0xcd   : > { %v197_v40 = vadd.f32 %v196_v39, %v195_v38 }
  0xcf   : > { %v198_v41 = vsel %vm188_vm4, %v197_v40, 0.0 }
  0xd0   : > { %199 = vadd.xlane.f32.xlu0 %v198_v41 }
 0x15d   : > { %v200_v42 = vpop.xlane.xlu0 %199 }
 0x15e   : > { %201 = vst [vmem:[%s133_s17] sm:$0x1] %v200_v42 }
 0x15f   : > { %386 = shalt.err (!%p383_p2)
}
 0x160   : > { %s387_s16 = scalar_lea.hbm %s576_s4, 16  ;;  %s391_s22 = scalar_lea.hbm %s619_s1, 32 }
 0x161   : > { %p388_p4 = scmp.ne.s32.totalorder %s576_s4, %s387_s16  ;;  %p392_p9 = scmp.lt.u32.totalorder %s576_s4, %s619_s1 }
 0x162   : > { %p393_p1 = scmp.lt.u32.totalorder %s391_s22, %s387_s16  ;;  %p395_p6 = scmp.lt.u32.totalorder %s387_s16, %s576_s4 }
 0x163   : > { %p389_p5 = pnand %p388_p4, %p626_p11 }
 0x164   : > { %p394_p3 = por %p393_p1, %p392_p9 }
 0x165   : > { %p390_p7 = pneg %p389_p5 }
 0x166   : > { %p396_p12 = por %p395_p6, %p394_p3 }
 0x168   : > { %p397_p13 = pnand %p396_p12, %p390_p7 }
 0x16a   : > { %400 = shalt.err (!%p397_p13)
}
 0x16b   : > { %295 = dma.vmem_to_hbm [thread:$0]  (%p626_p11), %s571_s28, 16, %s576_s4, %s203_s5  }
 0x16c PF: > { %s227_s26 = sand.u32 1, %s427_s6   ;;  %p627_p8 = scmp.ne.s32.totalorder %s624_s19, 0 }
 0x16d   : > { %p628_p10 = scmp.ge.s32.totalorder %s439_s9, 2  ;;  %s228_s30 = scalar_lea.sflag [#allocation4], %s227_s26 }
 0x16f   : > { %p302_p0 = pnand %p628_p10, %p627_p8 }
 0x171   : > { %422 = dma.done.wait (!%p302_p0), %s228_s30, 16  }
 0x172   : > { %424 = vsyncadd (!%p302_p0), %s228_s30, 4294967280  ;;  %p14_p2 = scmp.ge.s32.totalorder %s482_s12, 4   ;;  %s629_s6 = smov %s431_s7 }
 0x173   : > { %s630_s7 = smov %s435_s8  ;;  %s631_s8 = smov %s494_s15 }
 0x174   : > { %s632_s9 = smov %s482_s12  ;;  %16 = sbr.rel (!%p14_p2) target bundleno = 5 (0x5), region = 69 }
 0x17b   :  { %232 = vsyncpa [#allocation3], 1 }
 0x17c   :  { %234 = vsyncpa [#allocation3 + $0x1], 1 }
 0x17d   :  { %235 = vsyncpa [#allocation4], 1 }
 0x17e   :  { %237 = vsyncpa [#allocation4 + $0x1], 1 }

</bundles_post_ra>
